<compile_context>
chip_gen: v6e
topology: v6e:2x2x1
jax: 0.10.0
libtpu: 0.0.40
codegen_flags: <defaults>
</compile_context>

<pallas_src>
import math

import jax
import jax.numpy as jnp
from jax.experimental import pallas as pl
from jax.experimental.pallas import tpu as pltpu


_LANES = 128       # pad D to a multiple of this so output stores are unmasked
_SUBLANES = 8
_E_CHUNK = 256     # table-row chunk for the one-hot fallback path


def build_sinusoidal_table(embedding_dim: int, num_embeddings: int = 1024,
                           dtype=jnp.float32):
    """Deterministic parameter init, identical math to the PyTorch __init__."""
    half_dim = embedding_dim // 2
    # TODO(synk): embedding_dim == 2 divides by zero, same latent bug as the
    # PyTorch reference; intentionally not guarded to keep semantics identical.
    scale = math.log(10000.0) / (half_dim - 1)
    freqs = jnp.exp(jnp.arange(half_dim, dtype=jnp.float32) * -scale)
    args = jnp.arange(num_embeddings, dtype=jnp.float32)[:, None] * freqs[None, :]
    table = jnp.concatenate([jnp.sin(args), jnp.cos(args)], axis=1)
    if embedding_dim % 2 == 1:
        table = jnp.concatenate(
            [table, jnp.zeros((num_embeddings, 1), jnp.float32)], axis=1)
    table = table.at[0, :].set(0.0)  # emb[0, :] = 0
    return table.astype(dtype)


def _take_gather_kernel(pos_ref, tab_ref, out_ref):
    # pos_ref: (TQ, 1) int32 position ids for this block.
    # tab_ref: (E_pad, D_pad) table, VMEM-resident for the whole kernel
    #          (constant index_map => DMA'd from HBM exactly once).
    # out_ref: (TQ, D_pad) lane-dense output block.
    e = tab_ref.shape[0]
    pos = jnp.clip(pos_ref[...][:, 0], 0, e - 1)               # clip in-kernel
    rows = jnp.take(tab_ref[...], pos, axis=0, mode="clip")    # (TQ, D_pad)
    out_ref[...] = rows.astype(out_ref.dtype)


def _onehot_gather_kernel(pos_ref, tab_ref, out_ref, acc_ref):
    # Fallback (only used if the take/gather above fails to lower):
    # chunked one-hot @ table so the live one-hot stays <= (TQ, 256) and the
    # partial products accumulate into an f32 VMEM scratch (no vreg spill).
    tq = pos_ref.shape[0]
    e = tab_ref.shape[0]                                       # multiple of _E_CHUNK
    pos = jnp.clip(pos_ref[...], 0, e - 1)                     # (TQ, 1)
    acc_ref[...] = jnp.zeros_like(acc_ref)
    for c0 in range(0, e, _E_CHUNK):                           # static chunks
        ids = c0 + jax.lax.broadcasted_iota(jnp.int32, (tq, _E_CHUNK), 1)
        onehot = (pos == ids).astype(tab_ref.dtype)            # (TQ, 256)
        acc_ref[...] += jnp.dot(onehot, tab_ref[pl.ds(c0, _E_CHUNK), :],
                                preferred_element_type=jnp.float32)
    out_ref[...] = acc_ref[...].astype(out_ref.dtype)


def _round_up(x: int, m: int) -> int:
    return -(-x // m) * m


def sinusoidal_positional_embedding(positions, weight, block_rows: int = 256,
                                    prefer_take: bool = True):
    """positions: int array, any shape.  weight: (num_embeddings, D) table.

    Returns a weight.dtype array of shape positions.shape + (D,) — same
    semantics as weight.index_select(0, positions.view(-1)).view(
    positions.size() + (D,)).
    """
    e, d = weight.shape
    out_dtype = weight.dtype

    flat = positions.reshape(-1).astype(jnp.int32)
    n = flat.shape[0]
    if n == 0:                                   # empty-input guard
        return jnp.zeros(positions.shape + (d,), out_dtype)

    # Lane-dense table / output: pad D up to a multiple of 128; pad E up to a
    # multiple of the one-hot chunk (zero rows, never selected by valid ids).
    d_pad = _round_up(max(d, _LANES), _LANES)
    e_pad = _round_up(e, _E_CHUNK)
    w = weight
    if (e_pad, d_pad) != (e, d):
        w = jnp.pad(weight, ((0, e_pad - e), (0, d_pad - d)))

    # Rows per grid step: multiple of 8 sublanes, capped at block_rows, and
    # split into >= 2 grid steps when possible so both v7x TCs get work
    # (dimension_semantics="parallel"; harmless on v5e/v6e).
    n8 = _round_up(n, _SUBLANES)
    tq = min(block_rows, n8)
    if n8 >= 2 * _SUBLANES:
        tq = min(tq, _round_up(n8 // 2, _SUBLANES))
    n_pad = _round_up(n, tq)
    if n_pad != n:
        flat = jnp.concatenate([flat, jnp.zeros((n_pad - n,), jnp.int32)])
    pos2d = flat.reshape(n_pad, 1)
    grid = (n_pad // tq,)

    def build(kernel, scratch_shapes):
        return pl.pallas_call(
            kernel,
            out_shape=jax.ShapeDtypeStruct((n_pad, d_pad), out_dtype),
            grid_spec=pltpu.PrefetchScalarGridSpec(
                num_scalar_prefetch=0,
                grid=grid,
                in_specs=[
                    # TQ position ids per step (VMEM: the gather consumes them
                    # as a vector on the VPU side, so SMEM is not the home).
                    pl.BlockSpec((tq, 1), lambda i: (i, 0)),
                    # Full table, constant block index => DMA'd once.
                    pl.BlockSpec((e_pad, d_pad), lambda i: (0, 0)),
                ],
                out_specs=pl.BlockSpec((tq, d_pad), lambda i: (i, 0)),
                scratch_shapes=scratch_shapes),
            compiler_params=pltpu.CompilerParams(
                dimension_semantics=("parallel",),
                vmem_limit_bytes=32 * 1024 * 1024),
        )

    if prefer_take:
        try:
            out_flat = build(_take_gather_kernel, [])(pos2d, w)
        except Exception:
            # Mosaic could not lower the dynamic gather for these shapes:
            # fall back to the chunked one-hot @ table path (always lowers).
            out_flat = build(_onehot_gather_kernel,
                             [pltpu.VMEM((tq, d_pad), jnp.float32)])(pos2d, w)
    else:
        out_flat = build(_onehot_gather_kernel,
                         [pltpu.VMEM((tq, d_pad), jnp.float32)])(pos2d, w)

    return out_flat[:n, :d].reshape(positions.shape + (d,))


if __name__ == "__main__":
    embedding_dim = 32
    num_embeddings = 64
    batch, seq = 2, 8

    weight = build_sinusoidal_table(embedding_dim, num_embeddings)

    key = jax.random.PRNGKey(0)
    positions = jax.random.randint(
        key, (batch, seq), minval=0, maxval=num_embeddings, dtype=jnp.int32)

    out = sinusoidal_positional_embedding(positions, weight)
    out = jax.block_until_ready(out)

    # Reference check (plain-JAX gather).
    ref = jnp.take(weight, positions.reshape(-1), axis=0).reshape(
        positions.shape + (embedding_dim,))
    assert out.shape == (batch, seq, embedding_dim)
    assert jnp.allclose(out, ref), "mismatch vs reference gather"

    print("KERNEL_OK")
</pallas_src>

<mosaic_0001>
module attributes {stable_mosaic.version = 11 : i64} {
  func.func @_onehot_gather_kernel(%arg0: i32, %arg1: memref<8x1xi32, #tpu.memory_space<vmem>>, %arg2: memref<256x128xf32, #tpu.memory_space<vmem>>, %arg3: memref<8x128xf32, #tpu.memory_space<vmem>>, %arg4: memref<8x128xf32, #tpu.memory_space<vmem>>) attributes {dimension_semantics = [#tpu.dimension_semantics<parallel>], iteration_bounds = array<i64: 2>, scalar_prefetch = 0 : i64, scratch_operands = 1 : i64, tpu.core_type = #tpu.core_type<tc>, window_params = [{transform_indices = @transform_0, window_bounds = array<i64: 8, 1>}, {pipeline_mode = #tpu.pipeline_mode<synchronous>, transform_indices = @transform_1, window_bounds = array<i64: 256, 128>}, {transform_indices = @transform_2, window_bounds = array<i64: 8, 128>}]} {
    %c0 = arith.constant 0 : index
    %c0_0 = arith.constant 0 : index
    %0 = vector.load %arg1[%c0, %c0_0] : memref<8x1xi32, #tpu.memory_space<vmem>>, vector<8x1xi32>
    %c0_i32 = arith.constant 0 : i32
    %c255_i32 = arith.constant 255 : i32
    %1 = vector.broadcast %c0_i32 : i32 to vector<8x1xi32>
    %2 = arith.maxsi %1, %0 : vector<8x1xi32>
    %3 = vector.broadcast %c255_i32 : i32 to vector<8x1xi32>
    %4 = arith.minsi %3, %2 : vector<8x1xi32>
    %cst = arith.constant 0.000000e+00 : f32
    %5 = vector.broadcast %cst : f32 to vector<8x128xf32>
    %c0_1 = arith.constant 0 : index
    %c0_2 = arith.constant 0 : index
    %6 = vector.load %arg4[%c0_1, %c0_2] : memref<8x128xf32, #tpu.memory_space<vmem>>, vector<8x128xf32>
    tpu.vector_store %arg4[%c0_1, %c0_2], %5 {strides = array<i32>} : memref<8x128xf32, #tpu.memory_space<vmem>>, vector<8x128xf32>,
    %7 = tpu.iota {dimensions = array<i32: 1>} : vector<8x256xi32>
    %c0_i32_3 = arith.constant 0 : i32
    %8 = vector.broadcast %c0_i32_3 : i32 to vector<8x256xi32>
    %9 = arith.addi %8, %7 : vector<8x256xi32>
    %10 = vector.broadcast %4 : vector<8x1xi32> to vector<8x256xi32>
    %11 = arith.cmpi eq, %10, %9 : vector<8x256xi32>
    %12 = arith.extui %11 : vector<8x256xi1> to vector<8x256xi32>
    %13 = arith.sitofp %12 : vector<8x256xi32> to vector<8x256xf32>
    %c0_4 = arith.constant 0 : index
    %c0_5 = arith.constant 0 : index
    %14 = vector.load %arg4[%c0_4, %c0_5] : memref<8x128xf32, #tpu.memory_space<vmem>>, vector<8x128xf32>
    %c0_6 = arith.constant 0 : index
    %c0_7 = arith.constant 0 : index
    %15 = vector.load %arg2[%c0_6, %c0_7] : memref<256x128xf32, #tpu.memory_space<vmem>>, vector<256x128xf32>
    %cst_8 = arith.constant dense<0.000000e+00> : vector<8x128xf32>
    %16 = tpu.matmul %13, %15, %cst_8 {dimension_numbers = #tpu.dot_dimension_numbers<[1], [0], [0], [1], [0, 0, 1, 1], [], []>} : vector<8x256xf32>, vector<256x128xf32>, vector<8x128xf32> -> vector<8x128xf32>
    %17 = arith.addf %14, %16 : vector<8x128xf32>
    %c0_9 = arith.constant 0 : index
    %c0_10 = arith.constant 0 : index
    %18 = vector.load %arg4[%c0_9, %c0_10] : memref<8x128xf32, #tpu.memory_space<vmem>>, vector<8x128xf32>
    tpu.vector_store %arg4[%c0_9, %c0_10], %17 {strides = array<i32>} : memref<8x128xf32, #tpu.memory_space<vmem>>, vector<8x128xf32>,
    %c0_11 = arith.constant 0 : index
    %c0_12 = arith.constant 0 : index
    %19 = vector.load %arg4[%c0_11, %c0_12] : memref<8x128xf32, #tpu.memory_space<vmem>>, vector<8x128xf32>
    %c0_13 = arith.constant 0 : index
    %c0_14 = arith.constant 0 : index
    %20 = vector.load %arg3[%c0_13, %c0_14] : memref<8x128xf32, #tpu.memory_space<vmem>>, vector<8x128xf32>
    tpu.vector_store %arg3[%c0_13, %c0_14], %19 {strides = array<i32>} : memref<8x128xf32, #tpu.memory_space<vmem>>, vector<8x128xf32>,
    return
  }
  func.func @transform_0(%arg0: i32) -> (i32, i32) {
    %c0_i32 = arith.constant 0 : i32
    %c0_i32_0 = arith.constant 0 : i32
    return %arg0, %c0_i32 : i32, i32
  }
  func.func @transform_1(%arg0: i32) -> (i32, i32) {
    %c0_i32 = arith.constant 0 : i32
    %c0_i32_0 = arith.constant 0 : i32
    %c0_i32_1 = arith.constant 0 : i32
    return %c0_i32, %c0_i32_0 : i32, i32
  }
  func.func @transform_2(%arg0: i32) -> (i32, i32) {
    %c0_i32 = arith.constant 0 : i32
    %c0_i32_0 = arith.constant 0 : i32
    return %arg0, %c0_i32 : i32, i32
  }
}

</mosaic_0001>

<bundles_post_ra>
// kernel: tpu_custom_call.1
= control target key start
LH: loop header
LB: loop body
LE: loop exit
PB: predicated region body
PF: predicated region fallthrough
CT: control target
= control target key end

     0   :  { %7 = vsyncpa [#allocation4], 0  ;;  %s688_s0 = inlined_call_operand.vmem [shape: s32[16,1], index: 0, kind: input, shape index: {}]   ;;  %s689_s1 = inlined_call_operand.hbm [shape: f32[256,128], index: 1, kind: input, shape index: {}]   ;;  %s690_s2 = inlined_call_operand.hbm [shape: f32[16,128], index: 2, kind: output, shape index: {}]  }
   0x1   :  { %8 = vsyncpa [#allocation5], 0 }
   0x2   :  { %10 = vsyncpa [#allocation5 + $0x1], 0  ;;  %s583_s9 = smov 0   ;;  %s585_s10 = smov 0  }
   0x3   :  { %s587_s11 = smov 0   ;;  %s589_s12 = smov 0  }
   0x4 LB: > { %s604_s13 = sadd.s32 4294967295, %s560_s12   ;;  %s364_s14 = sadd.s32 4294967294, %s560_s12   ;;  %s560_s12 = sphi %s589_s12, %s698_s12   ;;  %s556_s11 = sphi %s587_s11, %s697_s11   ;;  %s552_s10 = sphi %s585_s10, %s696_s10   ;;  %s548_s9 = sphi %s583_s9, %s695_s9  }
   0x5   : > { %s608_s15 = sadd.s32 1, %s560_s12   ;;  %s70_s16 = sadd.s32 1, %s556_s11 }
   0x6   : > { %s67_s17 = ssub.s32 %s560_s12, %s608_s15  ;;  %p80_p0 = scmp.ne.s32.totalorder %s556_s11, %s552_s10 }
   0x7   : > { %p68_p1 = scmp.eq.s32.totalorder %s67_s17, 0  ;;  %p81_p2 = scmp.eq.s32.totalorder %s604_s13, 1 }
   0x8   : > { %p86_p3 = scmp.ne.s32.totalorder %s552_s10, %s548_s9  ;;  %p87_p4 = scmp.eq.s32.totalorder %s364_s14, 1 }
   0x9   : > { %s619_s18 = scalar_select %p68_p1, %s556_s11, %s70_s16  }
   0xa   : > { %p621_p5 = por %p81_p2, %p80_p0  ;;  %p625_p6 = por %p87_p4, %p86_p3 }
   0xb   : > { %p365_p7 = scmp.ge.s32.totalorder %s560_s12, 1  ;;  %p94_p8 = scmp.lt.s32.totalorder %s560_s12, 3 }
   0xc   : > { %s692_s20 = scalar_select %p625_p6, 1, 0 }
   0xd   : > { %p429_p9 = scmp.eq.s32.totalorder %s604_s13, 0  ;;  %p632_p10 = pnand %p365_p7, %p94_p8 }
   0xe   : > { %s562_s22 = smov [#allocation3]  }
   0xf   : > { %s106_s23 = sshll.u32 %s562_s22, 4  ;;  %p421_p11 = pneg %p632_p10  ;;  %s107_s23 = int_to_ptr.vmem [resolvable:$true] %s106_s23 }
  0x10   : > { %s481_s24 = scalar_lea.vmem %s107_s23, 4096  ;;  %p489_p3 = scmp.lt.s32.totalorder %s107_s23, %s107_s23 }
  0x11   : > { %p422_p12 = pnand %p429_p9, %p421_p11  ;;  %p482_p0 = scmp.ne.s32.totalorder %s107_s23, %s481_s24 }
  0x12   : > { %p490_p4 = scmp.lt.s32.totalorder %s481_s24, %s481_s24 }
  0x13   : > { %p472_p13 = pneg %p422_p12 }
  0x14   : > { %p491_p6 = por %p490_p4, %p489_p3 }
  0x15   : > { %p484_p1 = pnand %p482_p0, %p472_p13 }
  0x17   : > { %p485_p2 = pneg %p484_p1 }
  0x19   : > { %p492_p7 = pnand %p491_p6, %p485_p2 }
  0x1b   : > { %495 = shalt.err (!%p492_p7)
}
  0x1c   : > { %s563_s25 = smov 128   ;;  %s564_s26 = smov 8  }
  0x1d   : > { %424 = dma.hbm_to_vmem [thread:$0]  (!%p422_p12), %s689_s1, 4096, %s107_s23, [#allocation4], %s563_s25, %s563_s25, %s564_s26  }
  0x1e   : > { %129 = sbr.rel (%p632_p10) target bundleno = 383 (0x17f), region = 28 }
  0x23   : > { %539 = dma.done.wait (%p429_p9), [#allocation4], 4096  }
  0x24   : > { %541 = vsyncadd (%p429_p9), [#allocation4], 4294963200  ;;  %p150_p8 = scmp.lt.s32.totalorder %s604_s13, 1  ;;  %v565_v0 = vmov 0   ;;  %v204_v2 = vld [vmem:[#allocation3 + $0xf8] sm:$0xff]  ;;  %v203_v4 = vld [vmem:[#allocation3 + $0xf0] sm:$0xff]  ;;  %v160_v36 = vlaneseq }
  0x25   : > { %469 = vset.pattern.permute.xlu0 %v565_v0  ;;  %v188_v3 = vld [vmem:[#allocation3 + $0x78] sm:$0xff]  ;;  %380 = vmatprep.subr.mxu0 %v204_v2  ;;  %v187_v5 = vld [vmem:[#allocation3 + $0x70] sm:$0xff]  ;;  %v202_v7 = vld [vmem:[#allocation3 + $0xe8] sm:$0xff]  ;;  %v566_v40 = vmov 1.0   ;;  %s147_s6 = sand.u32 1, %s552_s10   ;;  %s377_s8 = sshll.u32 %s604_s13, 7 }
  0x26   : > { %s151_s29 = scalar_select %p150_p8, %s604_s13, 1  ;;  %381 = vmatpush3.msra.mxu0 %v188_v3  ;;  %v186_v8 = vld [vmem:[#allocation3 + $0x68] sm:$0xff]  ;;  %v201_v10 = vld [vmem:[#allocation3 + $0xe0] sm:$0xff]  ;;  %v200_v12 = vld [vmem:[#allocation3 + $0xd8] sm:$0xff]  ;;  %v161_v37 = vand.u32 127, %v160_v36 }
  0x27   : > { %382 = vmatprep.subr.mxu0 %v203_v4  ;;  %v185_v11 = vld [vmem:[#allocation3 + $0x60] sm:$0xff]  ;;  %v184_v13 = vld [vmem:[#allocation3 + $0x58] sm:$0xff]  ;;  %v199_v14 = vld [vmem:[#allocation3 + $0xd0] sm:$0xff]  ;;  %s370_s7 = sshll.u32 %s147_s6, 3  ;;  %s291_s22 = scalar_lea.hbm %s690_s2, %s377_s8 }
  0x28   : > { %s371_s30 = sshll.u32 %s151_s29, 3  ;;  %383 = vmatpush3.msra.mxu0 %v187_v5  ;;  %v183_v15 = vld [vmem:[#allocation3 + $0x50] sm:$0xff]  ;;  %v198_v16 = vld [vmem:[#allocation3 + $0xc8] sm:$0xff]  ;;  %v197_v18 = vld [vmem:[#allocation3 + $0xc0] sm:$0xff]  ;;  %v162_v38 = vadd.s32 128, %v161_v37  ;;  %s149_s14 = scalar_lea.vmem [#allocation6], %s370_s7 }
  0x29   : > { %s153_s5 = scalar_lea.vmem %s688_s0, %s371_s30  ;;  %384 = vmatprep.subr.mxu0 %v202_v7  ;;  %v182_v17 = vld [vmem:[#allocation3 + $0x48] sm:$0xff]  ;;  %v181_v19 = vld [vmem:[#allocation3 + $0x40] sm:$0xff]  ;;  %v196_v20 = vld [vmem:[#allocation3 + $0xb8] sm:$0xff]  ;;  %s293_s16 = sshll.u32 %s149_s14, 4  ;;  %s294_s16 = int_to_ptr.vmem [resolvable:$true] %s293_s16 }
  0x2a   : > { %v154_v1 = vld [vmem:[%s153_s5] sm:$0xff]  ;;  %385 = vmatpush3.msra.mxu0 %v186_v8  ;;  %v180_v21 = vld [vmem:[#allocation3 + $0x38] sm:$0xff]  ;;  %v195_v22 = vld [vmem:[#allocation3 + $0xb0] sm:$0xff]  ;;  %s280_s23 = scalar_lea.sflag [#allocation5], %s147_s6  ;;  %s496_s24 = scalar_lea.vmem %s294_s16, 128 }
  0x2b   : > { %vm155_vm0 = vcmp.gt.s32.totalorder %v154_v1, 0  ;;  %386 = vmatprep.subr.mxu0 %v201_v10  ;;  %v179_v23 = vld [vmem:[#allocation3 + $0x30] sm:$0xff]  ;;  %v194_v24 = vld [vmem:[#allocation3 + $0xa8] sm:$0xff]  ;;  %v193_v26 = vld [vmem:[#allocation3 + $0xa0] sm:$0xff]  ;;  %p497_p6 = scmp.ne.s32.totalorder %s294_s16, %s496_s24  ;;  %s567_s25 = smov [#allocation6]  }
  0x2c   : > { %v156_v6 = vsel %vm155_vm0, %v154_v1, 0  ;;  %387 = vmatpush3.msra.mxu0 %v185_v11  ;;  %v178_v25 = vld [vmem:[#allocation3 + $0x28] sm:$0xff]  ;;  %v177_v27 = vld [vmem:[#allocation3 + $0x20] sm:$0xff]  ;;  %v192_v28 = vld [vmem:[#allocation3 + $0x98] sm:$0xff]  ;;  %s500_s26 = sshll.u32 %s567_s25, 4  ;;  %s501_s26 = int_to_ptr.vmem [resolvable:$false] %s500_s26 }
  0x2d   : > { %vm157_vm1 = vcmp.lt.s32.totalorder %v156_v6, 255  ;;  %388 = vmatprep.subr.mxu0 %v200_v12  ;;  %v176_v29 = vld [vmem:[#allocation3 + $0x18] sm:$0xff]  ;;  %v191_v30 = vld [vmem:[#allocation3 + $0x90] sm:$0xff]  ;;  %v190_v32 = vld [vmem:[#allocation3 + $0x88] sm:$0xff]  ;;  %p498_p9 = pnand %p497_p6, %p621_p5  ;;  %s502_s13 = scalar_lea.vmem %s501_s26, 256 }
  0x2e   : > { %v158_v9 = vsel %vm157_vm1, %v156_v6, 255  ;;  %389 = vmatpush3.msra.mxu0 %v184_v13  ;;  %v175_v31 = vld [vmem:[#allocation3 + $0x10] sm:$0xff]  ;;  %v174_v33 = vld [vmem:[#allocation3 + $0x8] sm:$0xff]  ;;  %v189_v34 = vld [vmem:[#allocation3 + $0x80] sm:$0xff]  ;;  %p503_p11 = scmp.lt.s32.totalorder %s294_s16, %s501_s26  ;;  %p504_p12 = scmp.lt.s32.totalorder %s502_s13, %s496_s24 }
  0x2f   : > { %164 = vperm.xlu0 %469, %v158_v9   ;;  %390 = vmatprep.subr.mxu0 %v199_v14  ;;  %v173_v35 = vld [vmem:[#allocation3] sm:$0xff]  ;;  %p499_p10 = pneg %p498_p9 }
  0x30   : > { %391 = vmatpush3.msra.mxu0 %v183_v15  ;;  %p505_p13 = por %p504_p12, %p503_p11 }
  0x31   : > { %392 = vmatprep.subr.mxu0 %v198_v16 }
  0x32   : > { %393 = vmatpush3.msra.mxu0 %v182_v17  ;;  %p506_p0 = pnand %p505_p13, %p499_p10 }
  0x33   : > { %394 = vmatprep.subr.mxu0 %v197_v18 }
  0x34   : > { %395 = vmatpush3.msra.mxu0 %v181_v19 }
  0x35   : > { %396 = vmatprep.subr.mxu0 %v196_v20 }
  0x36   : > { %397 = vmatpush3.msra.mxu0 %v180_v21 }
  0x37   : > { %398 = vmatprep.subr.mxu0 %v195_v22 }
  0x38   : > { %399 = vmatpush3.msra.mxu0 %v179_v23 }
  0x39   : > { %400 = vmatprep.subr.mxu0 %v194_v24 }
  0x3a   : > { %401 = vmatpush3.msra.mxu0 %v178_v25 }
  0x3b   : > { %402 = vmatprep.subr.mxu0 %v193_v26 }
  0x3c   : > { %403 = vmatpush3.msra.mxu0 %v177_v27 }
  0x3d   : > { %404 = vmatprep.subr.mxu0 %v192_v28 }
  0x3e   : > { %405 = vmatpush3.msra.mxu0 %v176_v29 }
  0x3f   : > { %406 = vmatprep.subr.mxu0 %v191_v30 }
  0x40   : > { %407 = vmatpush3.msra.mxu0 %v175_v31 }
  0x41   : > { %408 = vmatprep.subr.mxu0 %v190_v32 }
  0x42   : > { %409 = vmatpush3.msra.mxu0 %v174_v33 }
  0x43   : > { %410 = vmatprep.subr.mxu0 %v189_v34 }
  0x44   : > { %411 = vmatpush3.msra.mxu0 %v173_v35 }
  0xaa   : > { %v165_v39 = vpop.permute.xlu0 %164 }
  0xab   : > { %vm166_vm2 = vcmp.eq.s32.totalorder %v165_v39, %v161_v37  ;;  %vm167_vm3 = vcmp.eq.s32.totalorder %v165_v39, %v162_v38 }
  0xac   : > { %374 = vmatprep.mubr.msk.f32.mxu0 %vm167_vm3, %v566_v40 }
  0xad   : > { %375 = vmatmul.mubr.msk.f32.vlgmr.msra.gmra.mxu0 %vm166_vm2, %v566_v40 }
 0x16d   : > { %v412_v41 = vpop.f32.mrf.mxu0 }
 0x16f   : > { %v413_v42 = vpop.f32.mrf.mxu0 }
 0x170   : > { %v414_v43 = vadd.f32 %v413_v42, %v412_v41 }
 0x172   : > { %278 = vst [vmem:[%s149_s14] sm:$0xff] %v414_v43 }
 0x173   : > { %509 = shalt.err (!%p506_p0)
}
 0x174   : > { %s510_s27 = scalar_lea.hbm %s291_s22, 128  ;;  %s514_s30 = scalar_lea.hbm %s690_s2, 256 }
 0x175   : > { %p511_p1 = scmp.ne.s32.totalorder %s291_s22, %s510_s27  ;;  %p515_p4 = scmp.lt.s32.totalorder %s291_s22, %s690_s2 }
 0x176   : > { %p516_p7 = scmp.lt.s32.totalorder %s514_s30, %s510_s27 }
 0x177   : > { %p512_p2 = pnand %p511_p1, %p621_p5 }
 0x178   : > { %p517_p8 = por %p516_p7, %p515_p4 }
 0x179   : > { %p513_p3 = pneg %p512_p2 }
 0x17b   : > { %p518_p6 = pnand %p517_p8, %p513_p3 }
 0x17d   : > { %521 = shalt.err (!%p518_p6)
}
 0x17e   : > { %419 = dma.vmem_to_hbm [thread:$0]  (%p621_p5), %s294_s16, 128, %s291_s22, %s280_s23  }
 0x17f PF: > { %p431_p9 = scmp.ge.s32.totalorder %s560_s12, 2  ;;  %s305_s5 = sand.u32 1, %s548_s9  }
 0x180   : > { %p694_p10 = scmp.ne.s32.totalorder %s692_s20, 0  ;;  %s306_s6 = scalar_lea.sflag [#allocation5], %s305_s5 }
 0x182   : > { %p426_p11 = pnand %p431_p9, %p694_p10 }
 0x184   : > { %p427_p12 = pneg %p426_p11 }
 0x186   : > { %543 = dma.done.wait (%p427_p12), %s306_s6, 128  }
 0x187   : > { %545 = vsyncadd (%p427_p12), %s306_s6, 4294967168  ;;  %p13_p13 = scmp.ge.s32.totalorder %s608_s15, 4   ;;  %s695_s9 = smov %s552_s10 }
 0x188   : > { %s696_s10 = smov %s556_s11  ;;  %s697_s11 = smov %s619_s18 }
 0x189   : > { %s698_s12 = smov %s608_s15  ;;  %15 = sbr.rel (!%p13_p13) target bundleno = 4 (0x4), region = 68 }
 0x18e   :  { %311 = vsyncpa [#allocation4], 1 }
 0x18f   :  { %313 = vsyncpa [#allocation4 + $0x1], 1 }
 0x190   :  { %314 = vsyncpa [#allocation5], 1 }
 0x191   :  { %316 = vsyncpa [#allocation5 + $0x1], 1 }

</bundles_post_ra>
